<compile_context>
chip_gen: v7x
topology: tpu7x:2x2x1
jax: 0.10.0
libtpu: 0.0.40
codegen_flags: <defaults>
</compile_context>

<pallas_src>
import functools

import numpy as np
import jax
import jax.numpy as jnp
from jax.experimental import pallas as pl
from jax.experimental.pallas import tpu as pltpu

BATCH = 2
SEQ = 8
HIDDEN = 32
VOCAB = 16
EQ_TOKEN_INDEX = 1
EQ_POSITION = 3  # position of the "=" token in y[0, :]


def _fused_decode_kernel(tok_ref, emb_ref, w_ref, b_ref, o_ref, *,
                         batch, seq, eq_position):
    """Fused embedding lookup + decoder + RHS slice.

    tok_ref: (B*S, 1)            int32 token ids
    emb_ref: (VOCAB, HIDDEN)     f32 embedding table
    w_ref:   (HIDDEN, VOCAB)     f32 decoder weight
    b_ref:   (1, VOCAB)          f32 decoder bias
    o_ref:   (B, SEQ_RHS, VOCAB) f32 output (lane-dense; transposed in wrapper)
    """
    bs = tok_ref.shape[0]
    vocab = emb_ref.shape[0]

    # Embedding gather as a one-hot matmul (exact row selection, MXU path).
    tok = tok_ref[...]                                            # (B*S, 1)
    onehot = (tok == jax.lax.broadcasted_iota(jnp.int32, (bs, vocab), 1)
              ).astype(jnp.float32)                               # (B*S, V)
    h = jnp.dot(onehot, emb_ref[...],
                preferred_element_type=jnp.float32,
                precision=jax.lax.Precision.HIGHEST)              # (B*S, H)

    # Decoder: logits = h @ W + b
    logits = jnp.dot(h, w_ref[...],
                     preferred_element_type=jnp.float32,
                     precision=jax.lax.Precision.HIGHEST) + b_ref[...]  # (B*S, V)

    # Static RHS slice across all batch elements, written in one store.
    logits_bsv = logits.reshape(batch, seq, vocab)                # (B, S, V)
    o_ref[...] = logits_bsv[:, eq_position + 1:, :]               # (B, S_RHS, V)


@functools.partial(jax.jit, static_argnames=("eq_position",))
def model4hessian_forward(tokens, emb, w_dec, b_dec, *, eq_position):
    """tokens: (B, S) int32. Returns y_hat_rhs: (B, V, S - eq_position - 1)."""
    batch, seq = tokens.shape
    vocab, hidden = emb.shape
    seq_rhs = seq - (eq_position + 1)

    tok2d = tokens.reshape(batch * seq, 1).astype(jnp.int32)
    bias2d = b_dec.reshape(1, vocab).astype(jnp.float32)

    kernel = functools.partial(_fused_decode_kernel,
                               batch=batch, seq=seq, eq_position=eq_position)

    # Single grid-less pallas_call: all operands fit comfortably in VMEM, so
    # whole-array blocks are used — one pipeline step, one kernel dispatch.
    y_rhs_bsv = pl.pallas_call(
        kernel,
        out_shape=jax.ShapeDtypeStruct((batch, seq_rhs, vocab), jnp.float32),
        in_specs=[pl.BlockSpec(memory_space=pltpu.MemorySpace.VMEM)] * 4,
        out_specs=pl.BlockSpec(memory_space=pltpu.MemorySpace.VMEM),
    )(tok2d, emb.astype(jnp.float32), w_dec.astype(jnp.float32), bias2d)

    # y_hat.transpose(-2, -1) applied to the already-sliced logits (tiny, free).
    return jnp.swapaxes(y_rhs_bsv, -2, -1)                        # (B, V, S_RHS)


def compute_eq_position(y_first_row, eq_token_index):
    """Host-side, once: position of the '=' token in the fixed label row.

    Mirrors `int(torch.nonzero(y[0,:] == eq).squeeze())`: raises unless there
    is exactly one match (guards against the silent-argmax-of-all-False bug).
    """
    matches = np.nonzero(np.asarray(y_first_row) == eq_token_index)[0]
    if matches.size != 1:
        raise ValueError(
            f"expected exactly one eq token, found {matches.size}")
    return int(matches[0])


def _reference(tokens, emb, w_dec, b_dec, eq_position):
    h = emb[tokens].astype(jnp.float32)
    y_hat = jnp.einsum("bsh,hv->bsv", h, w_dec.astype(jnp.float32),
                       precision=jax.lax.Precision.HIGHEST) + b_dec
    y_hat = jnp.swapaxes(y_hat, -2, -1)        # transpose(-2, -1)
    return y_hat[..., eq_position + 1:]


if __name__ == "__main__":
    key = jax.random.PRNGKey(0)
    k_emb, k_w, k_b, k_tok = jax.random.split(key, 4)

    # deterministic synthetic "pl_module" parameters
    emb = jax.random.normal(k_emb, (VOCAB, HIDDEN), dtype=jnp.float32) * 0.1
    w_dec = jax.random.normal(k_w, (HIDDEN, VOCAB), dtype=jnp.float32) * 0.1
    b_dec = jax.random.normal(k_b, (VOCAB,), dtype=jnp.float32) * 0.1

    # example input token sequences (B, S)
    tokens = jax.random.randint(k_tok, (BATCH, SEQ), 0, VOCAB, dtype=jnp.int32)

    # fixed label row y[0, :] containing exactly one eq token
    y_first_row = jnp.zeros((SEQ,), dtype=jnp.int32).at[EQ_POSITION].set(
        EQ_TOKEN_INDEX)
    # TODO(synk): the real pl_module also returns attention maps / activations
    # (the three ignored outputs); there is no meaningful Pallas equivalent here.

    eq_position = compute_eq_position(y_first_row, EQ_TOKEN_INDEX)

    out = model4hessian_forward(tokens, emb, w_dec, b_dec,
                                eq_position=eq_position)
    out = jax.block_until_ready(out)

    ref = _reference(tokens, emb, w_dec, b_dec, eq_position)
    assert out.shape == (BATCH, VOCAB, SEQ - EQ_POSITION - 1), out.shape
    assert jnp.allclose(out, ref, atol=1e-5, rtol=1e-5), "mismatch vs reference"

    print("KERNEL_OK")
</pallas_src>

<mosaic_0001>
module attributes {stable_mosaic.version = 11 : i64} {
  func.func @_fused_decode_kernel(%arg0: memref<16x1xi32, #tpu.memory_space<vmem>>, %arg1: memref<16x32xf32, #tpu.memory_space<vmem>>, %arg2: memref<32x16xf32, #tpu.memory_space<vmem>>, %arg3: memref<1x16xf32, #tpu.memory_space<vmem>>, %arg4: memref<2x4x16xf32, #tpu.memory_space<vmem>>) attributes {dimension_semantics = [], scalar_prefetch = 0 : i64, scratch_operands = 0 : i64, tpu.core_type = #tpu.core_type<tc>} {
    %c0 = arith.constant 0 : index
    %c0_0 = arith.constant 0 : index
    %0 = vector.load %arg0[%c0, %c0_0] : memref<16x1xi32, #tpu.memory_space<vmem>>, vector<16x1xi32>
    %1 = tpu.iota {dimensions = array<i32: 1>} : vector<16x16xi32>
    %2 = vector.broadcast %0 : vector<16x1xi32> to vector<16x16xi32>
    %3 = arith.cmpi eq, %2, %1 : vector<16x16xi32>
    %4 = arith.extui %3 : vector<16x16xi1> to vector<16x16xi32>
    %5 = arith.sitofp %4 : vector<16x16xi32> to vector<16x16xf32>
    %c0_1 = arith.constant 0 : index
    %c0_2 = arith.constant 0 : index
    %6 = vector.load %arg1[%c0_1, %c0_2] : memref<16x32xf32, #tpu.memory_space<vmem>>, vector<16x32xf32>
    %cst = arith.constant dense<0.000000e+00> : vector<16x32xf32>
    %7 = tpu.matmul %5, %6, %cst {dimension_numbers = #tpu.dot_dimension_numbers<[1], [0], [0], [1], [0, 0, 1, 1], [], []>, precision = #tpu.contract_precision<fp32>} : vector<16x16xf32>, vector<16x32xf32>, vector<16x32xf32> -> vector<16x32xf32>
    %c0_3 = arith.constant 0 : index
    %c0_4 = arith.constant 0 : index
    %8 = vector.load %arg2[%c0_3, %c0_4] : memref<32x16xf32, #tpu.memory_space<vmem>>, vector<32x16xf32>
    %cst_5 = arith.constant dense<0.000000e+00> : vector<16x16xf32>
    %9 = tpu.matmul %7, %8, %cst_5 {dimension_numbers = #tpu.dot_dimension_numbers<[1], [0], [0], [1], [0, 0, 1, 1], [], []>, precision = #tpu.contract_precision<fp32>} : vector<16x32xf32>, vector<32x16xf32>, vector<16x16xf32> -> vector<16x16xf32>
    %c0_6 = arith.constant 0 : index
    %c0_7 = arith.constant 0 : index
    %10 = vector.load %arg3[%c0_6, %c0_7] : memref<1x16xf32, #tpu.memory_space<vmem>>, vector<1x16xf32>
    %11 = vector.broadcast %10 : vector<1x16xf32> to vector<16x16xf32>
    %12 = arith.addf %9, %11 : vector<16x16xf32>
    %13 = vector.shape_cast %12 : vector<16x16xf32> to vector<2x8x16xf32>
    %14 = vector.extract_strided_slice %13 {offsets = [0, 4, 0], sizes = [2, 4, 16], strides = [1, 1, 1]} : vector<2x8x16xf32> to vector<2x4x16xf32>
    %c0_8 = arith.constant 0 : index
    %c0_9 = arith.constant 0 : index
    %c0_10 = arith.constant 0 : index
    %15 = vector.load %arg4[%c0_8, %c0_9, %c0_10] : memref<2x4x16xf32, #tpu.memory_space<vmem>>, vector<2x4x16xf32>
    tpu.vector_store %arg4[%c0_8, %c0_9, %c0_10], %14 {strides = array<i32>} : memref<2x4x16xf32, #tpu.memory_space<vmem>>, vector<2x4x16xf32>,
    return
  }
}

</mosaic_0001>

<bundles_post_ra>
// kernel: model4hessian_forward.1
= control target key start
LH: loop header
LB: loop body
LE: loop exit
PB: predicated region body
PF: predicated region fallthrough
CT: control target
= control target key end

     0   :  { %s1522_s0 = inlined_call_operand.vmem [shape: s32[16,1], index: 0, kind: input, shape index: {}]   ;;  %s1523_s1 = inlined_call_operand.vmem [shape: f32[16,32], index: 1, kind: input, shape index: {}]   ;;  %s1524_s2 = inlined_call_operand.vmem [shape: f32[32,16], index: 2, kind: input, shape index: {}]   ;;  %s1525_s3 = inlined_call_operand.vmem [shape: f32[1,16], index: 3, kind: input, shape index: {}]   ;;  %s1526_s4 = inlined_call_operand.hbm [shape: f32[2,4,16], index: 4, kind: output, shape index: {}]  }
   0x1   :  { %v18_v0 = vld [vmem:[%s1522_s0] sm:$0xff] }
   0x2   :  { %9 = vsyncpa [#allocation3], 0  ;;  %v1411_v1 = vmov 0   ;;  %v19_v2 = vld [vmem:[%s1522_s0 + $0x8] sm:$0xff]  ;;  %v34_v3 = vld [vmem:[%s1523_s1] sm:$0xff]  ;;  %v20_v33 = vlaneseq  ;;  %vm36_vm0 = vcmask 130048  }
   0x3   :  { %1386 = vset.pattern.permute.xlu0 %v1411_v1  ;;  %v35_v4 = vld [vmem:[%s1523_s1 + $0x8] sm:$0xff]  ;;  %v44_v5 = vand.u32 4294901760, %v34_v3  ;;  %v545_v19 = vld [vmem:[%s1524_s2] sm:$0xff]  ;;  %v1412_v36 = vmov 0.0   ;;  %v547_v50 = vld [vmem:[%s1524_s2 + $0x10] sm:$0xff]  ;;  %vm556_vm3 = vcmask 261120  }
   0x4   :  { %23 = vperm.xlu0 %1386, %v18_v0   ;;  %v47_v6 = vand.u32 4294901760, %v35_v4  ;;  %v546_v20 = vld [vmem:[%s1524_s2 + $0x8] sm:$0xff]  ;;  %v564_v21 = vand.u32 4294901760, %v545_v19  ;;  %v21_v34 = vand.u32 127, %v20_v33  ;;  %v548_v51 = vld [vmem:[%s1524_s2 + $0x18] sm:$0xff]  ;;  %v570_v52 = vand.u32 4294901760, %v547_v50 }
   0x5   :  { %v132_v8 = vsub.f32 %v34_v3, %v44_v5  ;;  %v567_v22 = vand.u32 4294901760, %v546_v20  ;;  %v573_v53 = vand.u32 4294901760, %v548_v51  ;;  %s1413_s30 = smov [#allocation2]   ;;  %vm1091_vm4 = vcmask 130052  }
   0x6   :  { %v1453_v7 = vpack.c.bf16 %v47_v6, %v44_v5  ;;  %v139_v9 = vsub.f32 %v35_v4, %v47_v6  ;;  %v1465_v24 = vsub.f32 %v545_v19, %v564_v21  ;;  %v668_v54 = vsub.f32 %v547_v50, %v570_v52  ;;  %s1099_s5 = sshll.u32 %s1413_s30, 4  ;;  %s1100_s5 = int_to_ptr.vmem [resolvable:$true] %s1099_s5 }
   0x7   :  { %v133_v10 = vand.u32 4294901760, %v132_v8  ;;  %v1463_v23 = vpack.c.bf16 %v567_v22, %v564_v21  ;;  %v1467_v25 = vsub.f32 %v546_v20, %v567_v22  ;;  %v675_v55 = vsub.f32 %v548_v51, %v573_v53  ;;  %v1118_v20 = vld [vmem:[%s1525_s3] ss:$0 sm:$0xff]  ;;  %s1387_s6 = scalar_lea.vmem %s1100_s5, 128  ;;  %p1392_p1 = scmp.lt.s32.totalorder %s1100_s5, %s1100_s5 }
   0x8   :  { %26 = vperm.xlu0 %1386, %v19_v2   ;;  %1288 = vmatprep.subr.bf16.mxu0 %v1453_v7  ;;  %v140_v11 = vand.u32 4294901760, %v139_v9  ;;  %v1295_v16 = vpack.c.bf16 %v139_v9, %v132_v8  ;;  %v655_v26 = vand.u32 4294901760, %v1465_v24  ;;  %v669_v56 = vand.u32 4294901760, %v668_v54  ;;  %p1388_p0 = scmp.ne.s32.totalorder %s1100_s5, %s1387_s6  ;;  %p1393_p2 = scmp.lt.s32.totalorder %s1387_s6, %s1387_s6 }
   0x9   :  { %1290 = vmatpush3.bf16.msra.mxu0 %v1453_v7  ;;  %v134_v12 = vsub.f32 %v132_v8, %v133_v10  ;;  %v662_v27 = vand.u32 4294901760, %v1467_v25  ;;  %v676_v57 = vand.u32 4294901760, %v675_v55  ;;  %v1327_v63 = vpack.c.bf16 %v1467_v25, %v1465_v24 }
   0xa   :  { %v141_v13 = vsub.f32 %v139_v9, %v140_v11  ;;  %v1303_v18 = vpack.c.bf16 %v140_v11, %v133_v10  ;;  %v656_v28 = vsub.f32 %v1465_v24, %v655_v26  ;;  %v670_v58 = vsub.f32 %v668_v54, %v669_v56  ;;  %p1394_p3 = por %p1393_p2, %p1392_p1 }
   0xb   :  { %v135_v14 = vand.u32 4294901760, %v134_v12  ;;  %v663_v29 = vsub.f32 %v1467_v25, %v662_v27  ;;  %v677_v59 = vsub.f32 %v675_v55, %v676_v57  ;;  %v1315_v0 = vpack.c.bf16 %v573_v53, %v570_v52 }
   0xc   :  { %v142_v15 = vand.u32 4294901760, %v141_v13  ;;  %v657_v30 = vand.u32 4294901760, %v656_v28  ;;  %v671_v60 = vand.u32 4294901760, %v670_v58  ;;  %v1331_v1 = vpack.c.bf16 %v675_v55, %v668_v54  ;;  %p1395_p4 = pnand %p1394_p3, %p1388_p0 }
   0xd   :  { %v664_v31 = vand.u32 4294901760, %v663_v29  ;;  %v678_v61 = vand.u32 4294901760, %v677_v59  ;;  %v1347_v2 = vpack.c.bf16 %v676_v57, %v669_v56 }
   0xe   :  { %v1291_v17 = vpack.c.bf16 %v142_v15, %v135_v14 }
   0xf   :  { %v1319_v32 = vpack.c.bf16 %v664_v31, %v657_v30  ;;  %v1323_v62 = vpack.c.bf16 %v678_v61, %v671_v60 }
  0x10   :  { %1292 = vmatprep.subr.bf16.mxu0 %v1291_v17 }
  0x11   :  { %1320 = vmatprep.subr.bf16.mxu1 %v1319_v32 }
  0x12   :  { %1322 = vmatpush3.bf16.msra.mxu1 %v1319_v32 }
  0x13   :  { %1324 = vmatprep.subr.bf16.mxu1 %v1323_v62 }
  0x16   :  { %1326 = vmatpush3.bf16.msra.mxu1 %v1323_v62 }
  0x17   :  { %1328 = vmatprep.subr.bf16.mxu1 %v1327_v63 }
  0x83   :  { %v24_v35 = vpop.permute.xlu0 %23 }
  0x84   :  { %vm28_vm1 = vcmp.eq.s32.totalorder %v24_v35, %v21_v34 }
  0x85   :  { %v1110_v37 = vsel %vm28_vm1, 1.0, %v1412_v36 }
  0x86   :  { %v38_v38 = vsel %vm36_vm0, %v1110_v37, 0 }
  0x87   :  { %v27_v39 = vpop.permute.xlu0 %26  ;;  %v111_v40 = vsub.f32 %v38_v38, %v38_v38 }
  0x88   :  { %vm29_vm2 = vcmp.eq.s32.totalorder %v27_v39, %v21_v34 }
  0x89   :  { %v1111_v41 = vsel %vm29_vm2, 1.0, %v1412_v36  ;;  %v112_v42 = vand.u32 4294901760, %v111_v40 }
  0x8a   :  { %v41_v43 = vsel %vm36_vm0, %v1111_v41, 0 }
  0x8b   :  { %v121_v44 = vsub.f32 %v41_v43, %v41_v43  ;;  %v113_v45 = vsub.f32 %v111_v40, %v112_v42 }
  0x8d   :  { %v114_v46 = vand.u32 4294901760, %v113_v45  ;;  %v122_v47 = vand.u32 4294901760, %v121_v44 }
  0x8f   :  { %1183 = vmatprep.mubr.f32.mxu0 %v114_v46  ;;  %v123_v48 = vsub.f32 %v121_v44, %v122_v47 }
  0x91   :  { %v124_v49 = vand.u32 4294901760, %v123_v48 }
  0x93   :  { %1184 = vmatmul.mubr.f32.vlgmr.msra.gmra.mrb[0].mxu0 %v124_v49 }
  0x94   :  { %1294 = vmatpush3.bf16.msra.mxu0 %v1291_v17  ;;  %1190 = vmatprep.mubr.msk.f32.mxu0 %vm36_vm0, %v1110_v37  ;;  %v1343_v17 = vpack.c.bf16 %v662_v27, %v655_v26 }
  0x95   :  { %1296 = vmatprep.subr.bf16.mxu0 %v1295_v16 }
  0x9b   :  { %1191 = vmatmul.mubr.msk.f32.vlgmr.msra.gmra.mrb[0].mxu0 %vm36_vm0, %v1111_v41 }
  0x9c   :  { %1298 = vmatpush3.bf16.msra.mxu0 %v1295_v16  ;;  %1197 = vmatprep.mubr.f32.mxu0 %v111_v40 }
  0x9d   :  { %1300 = vmatprep.subr.bf16.mxu0 %v1453_v7 }
  0xa3   :  { %1198 = vmatmul.mubr.f32.vlgmr.msra.gmra.mrb[0].mxu0 %v121_v44 }
  0xa4   :  { %1302 = vmatpush3.bf16.msra.mxu0 %v1453_v7  ;;  %1204 = vmatprep.mubr.f32.mxu0 %v112_v42 }
  0xa5   :  { %1304 = vmatprep.subr.bf16.mxu0 %v1303_v18 }
  0xab   :  { %1205 = vmatmul.mubr.f32.vlgmr.msra.gmra.mrb[0].mxu0 %v122_v47 }
  0xac   :  { %1306 = vmatpush3.bf16.msra.mxu0 %v1303_v18  ;;  %1211 = vmatprep.mubr.msk.f32.mxu0 %vm36_vm0, %v1110_v37 }
  0xad   :  { %1308 = vmatprep.subr.bf16.mxu0 %v1453_v7 }
  0xb3   :  { %1212 = vmatmul.mubr.msk.f32.vlgmr.msra.gmra.mrb[0].mxu0 %vm36_vm0, %v1111_v41 }
  0xb4   :  { %1310 = vmatpush3.bf16.msra.mxu0 %v1453_v7  ;;  %1218 = vmatprep.mubr.msk.f32.mxu0 %vm36_vm0, %v1110_v37 }
  0xb5   :  { %1312 = vmatprep.subr.bf16.mxu0 %v1463_v23 }
  0xbb   :  { %1219 = vmatmul.mubr.msk.f32.vlgmr.msra.gmra.mrb[0].mxu0 %vm36_vm0, %v1111_v41 }
  0xbc   :  { %1314 = vmatpush3.bf16.msra.mxu0 %v1463_v23 }
  0xbd   :  { %1316 = vmatprep.subr.bf16.mxu0 %v1315_v0 }
  0xc0   :  { %1318 = vmatpush3.bf16.msra.mxu0 %v1315_v0 }
 0x18e   :  { %v1220_v3 = vpop.f32.mrb[0].mxu0 }
 0x18f   :  { %v561_v4 = vsel %vm556_vm3, %v1220_v3, 0  ;;  %v535_v5 = vpop.f32.mrb[1].mxu0 }
 0x190   :  { %v642_v6 = vand.u32 4294901760, %v561_v4  ;;  %v558_v7 = vsel %vm556_vm3, %v535_v5, 0 }
 0x191   :  { %v632_v8 = vand.u32 4294901760, %v558_v7 }
 0x192   :  { %v643_v9 = vsub.f32 %v561_v4, %v642_v6 }
 0x193   :  { %v633_v10 = vsub.f32 %v558_v7, %v632_v8  ;;  %1240 = vmatprep.mubr.f32.mxu1 %v632_v8 }
 0x194   :  { %v644_v11 = vand.u32 4294901760, %v643_v9  ;;  %1241 = vmatmul.mubr.f32.vlgmr.msra.gmra.mrb[0].mxu1 %v642_v6 }
 0x195   :  { %v634_v12 = vand.u32 4294901760, %v633_v10  ;;  %1330 = vmatpush3.bf16.msra.mxu1 %v1327_v63  ;;  %1251 = vmatprep.mubr.f32.mxu1 %v633_v10 }
 0x196   :  { %v645_v13 = vsub.f32 %v643_v9, %v644_v11  ;;  %1332 = vmatprep.subr.bf16.mxu1 %v1331_v1 }
 0x197   :  { %v635_v14 = vsub.f32 %v633_v10, %v634_v12 }
 0x198   :  { %v646_v16 = vand.u32 4294901760, %v645_v13 }
 0x199   :  { %1334 = vmatpush3.bf16.msra.mxu1 %v1331_v1  ;;  %v636_v15 = vand.u32 4294901760, %v635_v14 }
 0x19a   :  { %1336 = vmatprep.subr.bf16.mxu1 %v1463_v23 }
 0x19b   :  { %1229 = vmatprep.mubr.f32.mxu0 %v636_v15 }
 0x19c   :  { %1230 = vmatmul.mubr.f32.vlgmr.msra.gmra.mrb[2].mxu0 %v646_v16  ;;  %1252 = vmatmul.mubr.f32.vlgmr.msra.gmra.mrb[0].mxu1 %v643_v9 }
 0x19d   :  { %1338 = vmatpush3.bf16.msra.mxu1 %v1463_v23  ;;  %1262 = vmatprep.mubr.f32.mxu1 %v634_v12 }
 0x19e   :  { %1340 = vmatprep.subr.bf16.mxu1 %v1315_v0 }
 0x1a1   :  { %1342 = vmatpush3.bf16.msra.mxu1 %v1315_v0 }
 0x1a2   :  { %1344 = vmatprep.subr.bf16.mxu1 %v1343_v17 }
 0x1a4   :  { %1263 = vmatmul.mubr.f32.vlgmr.msra.gmra.mrb[0].mxu1 %v644_v11 }
 0x1a5   :  { %1346 = vmatpush3.bf16.msra.mxu1 %v1343_v17  ;;  %1273 = vmatprep.mubr.f32.mxu1 %v632_v8 }
 0x1a6   :  { %1348 = vmatprep.subr.bf16.mxu1 %v1347_v2 }
 0x1a9   :  { %1350 = vmatpush3.bf16.msra.mxu1 %v1347_v2 }
 0x1aa   :  { %1352 = vmatprep.subr.bf16.mxu1 %v1463_v23 }
 0x1ac   :  { %1274 = vmatmul.mubr.f32.vlgmr.msra.gmra.mrb[0].mxu1 %v642_v6 }
 0x1ad   :  { %1354 = vmatpush3.bf16.msra.mxu1 %v1463_v23  ;;  %1284 = vmatprep.mubr.f32.mxu1 %v632_v8 }
 0x1ae   :  { %1356 = vmatprep.subr.bf16.mxu1 %v1315_v0 }
 0x1b1   :  { %1358 = vmatpush3.bf16.msra.mxu1 %v1315_v0 }
 0x1b4   :  { %1285 = vmatmul.mubr.f32.vlgmr.msra.gmra.mrb[0].mxu1 %v642_v6 }
 0x26f   :  { %v1231_v18 = vpop.f32.mrb[2].mxu0 }
 0x270   :  { %v638_v19 = vpop.f32.mrb[3].mxu0  ;;  %v649_v21 = vadd.f32 %v1231_v18, %v1118_v20 }
 0x271   :  { %v639_v22 = vadd.f32 %v1118_v20, %v638_v19 }
 0x287   :  { %v1286_v24 = vpop.f32.mrb[0].mxu1 }
 0x288   :  { %v1360_v25 = vadd.f32 %v1286_v24, %v649_v21  ;;  %v1081_v26 = vpop.f32.mrb[1].mxu1 }
 0x289   :  { %v1362_v23 = vadd.f32 %v1081_v26, %v639_v22 }
 0x28a   :  { %1093 = vst.msk [vmem:[#allocation2] sm:$0xf0] %vm1091_vm4, %v1360_v25 }
 0x28b   :  { %1092 = vst.msk [vmem:[#allocation2 - $0x4] sm:$0xf0] %vm1091_vm4, %v1362_v23 }
 0x28c   :  { %1398 = shalt.err (!%p1395_p4)
}
 0x28d   :  { %s1399_s8 = scalar_lea.hbm %s1526_s4, 128 }
 0x28e   :  { %p1400_p5 = scmp.ne.s32.totalorder %s1526_s4, %s1399_s8  ;;  %p1403_p6 = scmp.lt.u32.totalorder %s1399_s8, %s1526_s4 }
 0x290   :  { %p1405_p7 = pnand %p1403_p6, %p1400_p5 }
 0x292   :  { %1408 = shalt.err (!%p1405_p7)
}
 0x293   :  { %s1414_s13 = smov 64   ;;  %s1415_s14 = smov 4  }
 0x294   :  { %1105 = dma.vmem_to_hbm [thread:$0]  %s1100_s5, 128, %s1526_s4, [#allocation3], %s1414_s13, %s1414_s13, %s1415_s14  }
 0x295   :  { %1409 = dma.done.wait [#allocation3], 128  }
 0x296   :  { %1410 = vsyncadd [#allocation3], 4294967168 }
 0x297   :  { %1109 = vsyncpa [#allocation3], 1 }

</bundles_post_ra>
